<compile_context>
chip_gen: v6e
topology: v6e:2x2x1
jax: 0.10.0
libtpu: 0.0.40
codegen_flags: <defaults>
</compile_context>

<pallas_src>
import math

import jax
import jax.numpy as jnp
import numpy as np
from jax.experimental import pallas as pl
from jax.experimental.pallas import tpu as pltpu

EPS = 1e-06


def _round_up(x, m):
    return ((x + m - 1) // m) * m


def make_rgb_uv_hist_kernel(h, sigma, intensity_scale, method, tile_n,
                            n_valid, chunks_per_split, mxu_dtype):
    """Per-(core-split, image, pixel-chunk) accumulation kernel.

    Accumulates the un-mirrored fused (2h,2h) block:
      acc[0:h , 0:h ] = sum_n Iy*K(bins-u0) K(bins-v0)^T   (true R plane)
      acc[0:h , h:2h] = sum_n Iy*K(bins-u0) K(bins-w0)^T   (G plane, u mirrored)
      acc[h:2h, h:2h] = sum_n Iy*K(bins-v0) K(bins-w0)^T   (B plane, u,v mirrored)
      acc[h:2h, 0:h ] = unused quadrant (cheaper than MXU padding)
    with u0 = log(R/G), v0 = log(R/B), w0 = log(G/B).  Since K depends only on
    d^2 and the bin centers are antisymmetric, mirroring on the small (h,h)
    quadrants (done in the wrapper) recovers the true G/B planes.
    """
    if method not in ('thresholding', 'RBF', 'inverse-quadratic'):
        raise ValueError('Wrong kernel method: %s' % method)

    inv_sigma = 1.0 / sigma
    thr_sq = (3.0 / h) ** 2            # original threshold: |d| <= (6/h)/2
    bin_step = 6.0 / (h - 1) if h > 1 else 0.0

    def kernel(x_ref, out_ref, lhs_ref, rhs_ref):
        c = pl.program_id(0)           # core-split index
        k = pl.program_id(2)           # pixel-chunk index within the split

        @pl.when(k == 0)
        def _init():
            out_ref[...] = jnp.zeros_like(out_ref)

        arr = x_ref[...]                                   # (3, TN), in [0, 1]

        # Exact masking of zero-padded tail / empty-split chunks.
        lane = jax.lax.broadcasted_iota(jnp.int32, (1, tile_n), 1)
        global_chunk = c * chunks_per_split + k
        valid = (lane + global_chunk * tile_n) < n_valid   # (1, TN) bool

        if intensity_scale:
            Iy = jnp.sqrt(jnp.sum(arr * arr, axis=0, keepdims=True) + EPS)
            Iy = jnp.where(valid, Iy, 0.0)
        else:
            Iy = jnp.where(valid, 1.0, 0.0)

        logI = jnp.log(arr + EPS)                          # one (3, TN) EUP pass
        lr = logI[0:1, :]
        lg = logI[1:2, :]
        lb = logI[2:3, :]
        u0 = lr - lg                                       # log(R/G)
        v0 = lr - lb                                       # log(R/B)
        w0 = lg - lb                                       # log(G/B)

        # Bin centers baked in-kernel (no second input / DMA).
        bin_idx = jax.lax.broadcasted_iota(jnp.int32, (h, 1), 0).astype(jnp.float32)
        bins = bin_idx * bin_step - 3.0                    # (h, 1)

        if method == 'thresholding':
            def kern(cvec):                                # cvec: (1, TN)
                d = bins - cvec                            # (h, TN)
                return (d * d <= thr_sq).astype(jnp.float32)
        elif method == 'RBF':
            bins = bins * inv_sigma
            u0 = u0 * inv_sigma
            v0 = v0 * inv_sigma
            w0 = w0 * inv_sigma

            def kern(cvec):
                d = bins - cvec
                return jnp.exp(-(d * d))
        else:  # inverse-quadratic
            bins = bins * inv_sigma
            u0 = u0 * inv_sigma
            v0 = v0 * inv_sigma
            w0 = w0 * inv_sigma

            def kern(cvec):
                d = bins - cvec
                q = 1.0 + d * d
                # EUP approx reciprocal + one Newton step (~2^-24 rel error).
                r = pl.reciprocal(q, approx=True)
                return r * (2.0 - q * r)

        ka = kern(u0)                                      # (h, TN)
        kb = kern(v0)
        kc = kern(w0)

        # Fill the fused (2h, TN) LHS / RHS scratch halves.
        lhs_ref[:h, :] = (Iy * ka).astype(mxu_dtype)
        lhs_ref[h:, :] = (Iy * kb).astype(mxu_dtype)
        rhs_ref[:h, :] = kb.astype(mxu_dtype)
        rhs_ref[h:, :] = kc.astype(mxu_dtype)

        # One (2h,TN) x (TN,2h) -> (2h,2h) MXU accumulate into the resident,
        # lane-dense output block.  Contraction on (1,1) == A @ B^T, which
        # Mosaic lowers with a transposed RHS push (no materialized vxpose).
        out_ref[...] += jax.lax.dot_general(
            lhs_ref[...], rhs_ref[...],
            dimension_numbers=(((1,), (1,)), ((), ())),
            preferred_element_type=jnp.float32)

    return kernel


def rgb_uv_hist_block(x, *, h=64, insz=150, resizing='interpolation',
                      method='inverse-quadratic', sigma=0.02,
                      intensity_scale=True, tile_n=4096,
                      mxu_dtype=jnp.float32):
    """Pallas implementation of RGBuvHistBlock.forward.  x is NCHW float."""
    x = jnp.clip(x.astype(jnp.float32), 0.0, 1.0)
    B, C, H, W = x.shape

    # NOTE: for large inputs this resize (a plain XLA op) can dominate wall
    # clock; the kernel itself is compute-bound and moves ~270 KB/image.
    if H > insz or W > insz:
        if resizing == 'interpolation':
            x = jax.image.resize(x, (B, C, insz, insz), method='bilinear',
                                 antialias=False)
        elif resizing == 'sampling':
            inds_1 = np.linspace(0, H, num=h, endpoint=False).astype(np.int32)
            inds_2 = np.linspace(0, W, num=h, endpoint=False).astype(np.int32)
            x = x[:, :, inds_1, :][:, :, :, inds_2]
        else:
            raise ValueError('Wrong resizing method: %s' % resizing)

    if x.shape[1] > 3:
        x = x[:, :3, :, :]

    Hs, Ws = x.shape[2], x.shape[3]
    N = Hs * Ws
    x_flat = x.reshape(B, 3, N)

    # Lane-aligned pixel chunks.  Default TN=4096 keeps every (h,TN)/(2h,TN)
    # f32 intermediate at 1-2 MiB; cap at 8192 so the live set stays well
    # inside v7x's 64 MiB VMEM.
    tn = min(max(tile_n, 128), _round_up(N, 128))
    tn = _round_up(tn, 128)
    tn = min(tn, 8192)
    n_chunks = math.ceil(N / tn)

    # Leading core-split axis: gives both v7x TensorCores work even when the
    # batch axis alone would idle one.  Harmless (one extra partial) on 1-TC
    # chips.
    n_splits = 2 if n_chunks >= 2 else 1
    chunks_per_split = math.ceil(n_chunks / n_splits)
    n_pad = n_splits * chunks_per_split * tn
    if n_pad != N:
        x_flat = jnp.pad(x_flat, ((0, 0), (0, 0), (0, n_pad - N)))

    kernel = make_rgb_uv_hist_kernel(
        h=h, sigma=sigma, intensity_scale=intensity_scale, method=method,
        tile_n=tn, n_valid=N, chunks_per_split=chunks_per_split,
        mxu_dtype=mxu_dtype)

    raw = pl.pallas_call(
        kernel,
        out_shape=jax.ShapeDtypeStruct((n_splits, B, 2 * h, 2 * h), jnp.float32),
        grid=(n_splits, B, chunks_per_split),
        in_specs=[
            pl.BlockSpec((None, 3, tn),
                         lambda c, b, k: (b, 0, c * chunks_per_split + k)),
        ],
        out_specs=pl.BlockSpec((None, None, 2 * h, 2 * h),
                               lambda c, b, k: (c, b, 0, 0)),
        scratch_shapes=[
            pltpu.VMEM((2 * h, tn), mxu_dtype),   # fused LHS
            pltpu.VMEM((2 * h, tn), mxu_dtype),   # fused RHS
        ],
        compiler_params=pltpu.CompilerParams(
            dimension_semantics=("parallel", "parallel", "arbitrary"),
            vmem_limit_bytes=48 * 1024 * 1024),
    )(x_flat)

    # Reduce core-split partials, slice the three useful quadrants, undo the
    # bin-symmetry trick (mirror G's u axis, B's u and v axes), normalize.
    acc = jnp.sum(raw, axis=0)                             # (B, 2h, 2h)
    r_plane = acc[:, :h, :h]
    g_plane = jnp.flip(acc[:, :h, h:], axis=1)
    b_plane = jnp.flip(acc[:, h:, h:], axis=(1, 2))
    hists = jnp.stack([r_plane, g_plane, b_plane], axis=1)  # (B, 3, h, h)
    total = jnp.sum(hists, axis=(1, 2, 3), keepdims=True) + EPS
    return hists / total


def rgb_uv_hist_block_ref(x, *, h=64, sigma=0.02, method='inverse-quadratic',
                          intensity_scale=True):
    """Pure-JAX reference (no resizing; inputs already <= insz in the tests)."""
    x = jnp.clip(x.astype(jnp.float32), 0.0, 1.0)[:, :3]
    B = x.shape[0]
    bins = jnp.linspace(-3.0, 3.0, h, dtype=jnp.float32)
    I = x.reshape(B, 3, -1).transpose(0, 2, 1)              # (B, N, 3)
    if intensity_scale:
        Iy = jnp.sqrt(jnp.sum(I * I, axis=-1) + EPS)        # (B, N)
    else:
        Iy = jnp.ones(I.shape[:2], jnp.float32)
    logI = jnp.log(I + EPS)

    def kfn(d):                                             # d = |chroma - bins|
        if method == 'thresholding':
            return (d <= 3.0 / h).astype(jnp.float32)
        if method == 'RBF':
            return jnp.exp(-(d * d) / sigma ** 2)
        return 1.0 / (1.0 + d * d / sigma ** 2)

    def hist(c, u_idx, v_idx):
        Iu = logI[:, :, c] - logI[:, :, u_idx]
        Iv = logI[:, :, c] - logI[:, :, v_idx]
        du = jnp.abs(Iu[..., None] - bins)
        dv = jnp.abs(Iv[..., None] - bins)
        a = Iy[..., None] * kfn(du)
        return jnp.einsum('bnh,bnk->bhk', a, kfn(dv))

    hists = jnp.stack([hist(0, 1, 2), hist(1, 0, 2), hist(2, 0, 1)], axis=1)
    total = hists.sum(axis=(1, 2, 3)).reshape(-1, 1, 1, 1) + EPS
    return hists / total


if __name__ == "__main__":
    key = jax.random.PRNGKey(0)
    hbins = 64

    # Test 1: 4-channel batch (channel-slice path), values outside [0, 1] to
    # exercise the clamp, tile_n=128 so the multi-chunk / 2-split path runs.
    B, C, H, W = 2, 4, 16, 16
    x = jax.random.uniform(key, (B, C, H, W), dtype=jnp.float32,
                           minval=-0.2, maxval=1.2)
    out = rgb_uv_hist_block(x, h=hbins, insz=150, method='inverse-quadratic',
                            sigma=0.02, intensity_scale=True, tile_n=128)
    out = jax.block_until_ready(out)
    ref = jax.block_until_ready(rgb_uv_hist_block_ref(x, h=hbins, sigma=0.02))
    assert out.shape == (B, 3, hbins, hbins)
    assert jnp.allclose(out, ref, atol=1e-5, rtol=1e-4), "mismatch vs reference (test 1)"

    # Test 2: odd spatial size -> zero-padded, exactly-masked tail chunk.
    x2 = jax.random.uniform(jax.random.PRNGKey(1), (1, 3, 13, 13),
                            dtype=jnp.float32, minval=0.0, maxval=1.0)
    out2 = jax.block_until_ready(rgb_uv_hist_block(x2, h=hbins, tile_n=128))
    ref2 = jax.block_until_ready(rgb_uv_hist_block_ref(x2, h=hbins, sigma=0.02))
    assert jnp.allclose(out2, ref2, atol=1e-5, rtol=1e-4), "mismatch vs reference (test 2)"

    # Test 3: RBF method + intensity_scale=False, default tile_n (single chunk,
    # single split) — covers the previously untested branches.
    x3 = jax.random.uniform(jax.random.PRNGKey(2), (1, 3, 16, 16),
                            dtype=jnp.float32, minval=0.0, maxval=1.0)
    out3 = jax.block_until_ready(
        rgb_uv_hist_block(x3, h=hbins, method='RBF', sigma=0.02,
                          intensity_scale=False))
    ref3 = jax.block_until_ready(
        rgb_uv_hist_block_ref(x3, h=hbins, sigma=0.02, method='RBF',
                              intensity_scale=False))
    assert jnp.allclose(out3, ref3, atol=1e-5, rtol=1e-4), "mismatch vs reference (test 3)"
    # TODO(synk): 'thresholding' is implemented (d^2 <= thr^2) but not
    # numerically asserted here — exact 0/1 boundary comparisons are flaky.

    print("KERNEL_OK")
</pallas_src>

<mosaic_0001>
module attributes {stable_mosaic.version = 11 : i64} {
  func.func @kernel(%arg0: i32, %arg1: i32, %arg2: i32, %arg3: memref<1x3x128xf32, #tpu.memory_space<vmem>>, %arg4: memref<1x1x128x128xf32, #tpu.memory_space<vmem>>, %arg5: memref<128x128xf32, #tpu.memory_space<vmem>>, %arg6: memref<128x128xf32, #tpu.memory_space<vmem>>) attributes {dimension_semantics = [#tpu.dimension_semantics<parallel>, #tpu.dimension_semantics<parallel>, #tpu.dimension_semantics<arbitrary>], iteration_bounds = array<i64: 2, 2, 1>, scalar_prefetch = 0 : i64, scratch_operands = 2 : i64, tpu.core_type = #tpu.core_type<tc>, window_params = [{transform_indices = @transform_0, window_bounds = array<i64: 1, 3, 128>}, {transform_indices = @transform_1, window_bounds = array<i64: 1, 1, 128, 128>}]} {
    %c0_i32 = arith.constant 0 : i32
    %0 = arith.cmpi eq, %arg2, %c0_i32 : i32
    %1 = arith.extui %0 : i1 to i32
    %c0_i32_0 = arith.constant 0 : i32
    %2 = arith.cmpi ne, %1, %c0_i32_0 : i32
    scf.if %2 {
      %cst_38 = arith.constant 0.000000e+00 : f32
      %94 = vector.broadcast %cst_38 : f32 to vector<128x128xf32>
      %c0_39 = arith.constant 0 : index
      %c0_40 = arith.constant 0 : index
      %c0_41 = arith.constant 0 : index
      %c0_42 = arith.constant 0 : index
      %95 = vector.load %arg4[%c0_39, %c0_40, %c0_41, %c0_42] : memref<1x1x128x128xf32, #tpu.memory_space<vmem>>, vector<1x1x128x128xf32>
      %96 = vector.shape_cast %95 : vector<1x1x128x128xf32> to vector<128x128xf32>
      %97 = vector.shape_cast %94 : vector<128x128xf32> to vector<1x1x128x128xf32>
      tpu.vector_store %arg4[%c0_39, %c0_40, %c0_41, %c0_42], %97 {strides = array<i32>} : memref<1x1x128x128xf32, #tpu.memory_space<vmem>>, vector<1x1x128x128xf32>,
    } else {
    }
    %c0 = arith.constant 0 : index
    %c0_1 = arith.constant 0 : index
    %c0_2 = arith.constant 0 : index
    %3 = vector.load %arg3[%c0, %c0_1, %c0_2] : memref<1x3x128xf32, #tpu.memory_space<vmem>>, vector<1x3x128xf32>
    %4 = vector.shape_cast %3 : vector<1x3x128xf32> to vector<3x128xf32>
    %5 = tpu.iota {dimensions = array<i32: 1>} : vector<1x128xi32>
    %c1_i32 = arith.constant 1 : i32
    %6 = arith.muli %arg0, %c1_i32 : i32
    %7 = arith.addi %6, %arg2 : i32
    %c128_i32 = arith.constant 128 : i32
    %8 = arith.muli %7, %c128_i32 : i32
    %9 = vector.broadcast %8 : i32 to vector<1x128xi32>
    %10 = arith.addi %5, %9 : vector<1x128xi32>
    %c256_i32 = arith.constant 256 : i32
    %11 = vector.broadcast %c256_i32 : i32 to vector<1x128xi32>
    %12 = arith.cmpi slt, %10, %11 : vector<1x128xi32>
    %13 = arith.mulf %4, %4 : vector<3x128xf32>
    %cst = arith.constant dense<0.000000e+00> : vector<128xf32>
    %14 = vector.multi_reduction <add>, %13, %cst [0] : vector<3x128xf32> to vector<128xf32>
    %15 = vector.shape_cast %14 : vector<128xf32> to vector<1x128xf32>
    %cst_3 = arith.constant 9.99999997E-7 : f32
    %16 = vector.broadcast %cst_3 : f32 to vector<1x128xf32>
    %17 = arith.addf %15, %16 : vector<1x128xf32>
    %18 = math.sqrt %17 : vector<1x128xf32>
    %cst_4 = arith.constant 0.000000e+00 : f32
    %19 = vector.broadcast %cst_4 : f32 to vector<1x128xf32>
    %20 = arith.select %12, %18, %19 : vector<1x128xi1>, vector<1x128xf32>
    %cst_5 = arith.constant 9.99999997E-7 : f32
    %21 = vector.broadcast %cst_5 : f32 to vector<3x128xf32>
    %22 = arith.addf %4, %21 : vector<3x128xf32>
    %23 = math.log %22 : vector<3x128xf32>
    %24 = vector.extract_strided_slice %23 {offsets = [0, 0], sizes = [1, 128], strides = [1, 1]} : vector<3x128xf32> to vector<1x128xf32>
    %25 = vector.extract_strided_slice %23 {offsets = [1, 0], sizes = [1, 128], strides = [1, 1]} : vector<3x128xf32> to vector<1x128xf32>
    %26 = vector.extract_strided_slice %23 {offsets = [2, 0], sizes = [1, 128], strides = [1, 1]} : vector<3x128xf32> to vector<1x128xf32>
    %27 = arith.subf %24, %25 : vector<1x128xf32>
    %28 = arith.subf %24, %26 : vector<1x128xf32>
    %29 = arith.subf %25, %26 : vector<1x128xf32>
    %30 = tpu.iota {dimensions = array<i32: 0>} : vector<64x1xi32>
    %31 = arith.sitofp %30 : vector<64x1xi32> to vector<64x1xf32>
    %cst_6 = arith.constant 0.095238097 : f32
    %32 = vector.broadcast %cst_6 : f32 to vector<64x1xf32>
    %33 = arith.mulf %31, %32 : vector<64x1xf32>
    %cst_7 = arith.constant 3.000000e+00 : f32
    %34 = vector.broadcast %cst_7 : f32 to vector<64x1xf32>
    %35 = arith.subf %33, %34 : vector<64x1xf32>
    %cst_8 = arith.constant 5.000000e+01 : f32
    %36 = vector.broadcast %cst_8 : f32 to vector<64x1xf32>
    %37 = arith.mulf %35, %36 : vector<64x1xf32>
    %cst_9 = arith.constant 5.000000e+01 : f32
    %38 = vector.broadcast %cst_9 : f32 to vector<1x128xf32>
    %39 = arith.mulf %27, %38 : vector<1x128xf32>
    %cst_10 = arith.constant 5.000000e+01 : f32
    %40 = vector.broadcast %cst_10 : f32 to vector<1x128xf32>
    %41 = arith.mulf %28, %40 : vector<1x128xf32>
    %cst_11 = arith.constant 5.000000e+01 : f32
    %42 = vector.broadcast %cst_11 : f32 to vector<1x128xf32>
    %43 = arith.mulf %29, %42 : vector<1x128xf32>
    %44 = vector.broadcast %37 : vector<64x1xf32> to vector<64x128xf32>
    %45 = vector.broadcast %39 : vector<1x128xf32> to vector<64x128xf32>
    %46 = arith.subf %44, %45 : vector<64x128xf32>
    %47 = arith.mulf %46, %46 : vector<64x128xf32>
    %cst_12 = arith.constant 1.000000e+00 : f32
    %48 = vector.broadcast %cst_12 : f32 to vector<64x128xf32>
    %49 = arith.addf %48, %47 : vector<64x128xf32>
    %50 = tpu.reciprocal %49 {approx = true} : vector<64x128xf32> -> vector<64x128xf32>
    %51 = arith.mulf %49, %50 : vector<64x128xf32>
    %cst_13 = arith.constant 2.000000e+00 : f32
    %52 = vector.broadcast %cst_13 : f32 to vector<64x128xf32>
    %53 = arith.subf %52, %51 : vector<64x128xf32>
    %54 = arith.mulf %50, %53 : vector<64x128xf32>
    %55 = vector.broadcast %37 : vector<64x1xf32> to vector<64x128xf32>
    %56 = vector.broadcast %41 : vector<1x128xf32> to vector<64x128xf32>
    %57 = arith.subf %55, %56 : vector<64x128xf32>
    %58 = arith.mulf %57, %57 : vector<64x128xf32>
    %cst_14 = arith.constant 1.000000e+00 : f32
    %59 = vector.broadcast %cst_14 : f32 to vector<64x128xf32>
    %60 = arith.addf %59, %58 : vector<64x128xf32>
    %61 = tpu.reciprocal %60 {approx = true} : vector<64x128xf32> -> vector<64x128xf32>
    %62 = arith.mulf %60, %61 : vector<64x128xf32>
    %cst_15 = arith.constant 2.000000e+00 : f32
    %63 = vector.broadcast %cst_15 : f32 to vector<64x128xf32>
    %64 = arith.subf %63, %62 : vector<64x128xf32>
    %65 = arith.mulf %61, %64 : vector<64x128xf32>
    %66 = vector.broadcast %37 : vector<64x1xf32> to vector<64x128xf32>
    %67 = vector.broadcast %43 : vector<1x128xf32> to vector<64x128xf32>
    %68 = arith.subf %66, %67 : vector<64x128xf32>
    %69 = arith.mulf %68, %68 : vector<64x128xf32>
    %cst_16 = arith.constant 1.000000e+00 : f32
    %70 = vector.broadcast %cst_16 : f32 to vector<64x128xf32>
    %71 = arith.addf %70, %69 : vector<64x128xf32>
    %72 = tpu.reciprocal %71 {approx = true} : vector<64x128xf32> -> vector<64x128xf32>
    %73 = arith.mulf %71, %72 : vector<64x128xf32>
    %cst_17 = arith.constant 2.000000e+00 : f32
    %74 = vector.broadcast %cst_17 : f32 to vector<64x128xf32>
    %75 = arith.subf %74, %73 : vector<64x128xf32>
    %76 = arith.mulf %72, %75 : vector<64x128xf32>
    %77 = vector.broadcast %20 : vector<1x128xf32> to vector<64x128xf32>
    %78 = arith.mulf %77, %54 : vector<64x128xf32>
    %c0_18 = arith.constant 0 : index
    %c0_19 = arith.constant 0 : index
    %79 = vector.load %arg5[%c0_18, %c0_19] : memref<128x128xf32, #tpu.memory_space<vmem>>, vector<64x128xf32>
    tpu.vector_store %arg5[%c0_18, %c0_19], %78 {strides = array<i32>} : memref<128x128xf32, #tpu.memory_space<vmem>>, vector<64x128xf32>,
    %80 = vector.broadcast %20 : vector<1x128xf32> to vector<64x128xf32>
    %81 = arith.mulf %80, %65 : vector<64x128xf32>
    %c64 = arith.constant 64 : index
    %c0_20 = arith.constant 0 : index
    %82 = vector.load %arg5[%c64, %c0_20] : memref<128x128xf32, #tpu.memory_space<vmem>>, vector<64x128xf32>
    tpu.vector_store %arg5[%c64, %c0_20], %81 {strides = array<i32>} : memref<128x128xf32, #tpu.memory_space<vmem>>, vector<64x128xf32>,
    %c0_21 = arith.constant 0 : index
    %c0_22 = arith.constant 0 : index
    %83 = vector.load %arg6[%c0_21, %c0_22] : memref<128x128xf32, #tpu.memory_space<vmem>>, vector<64x128xf32>
    tpu.vector_store %arg6[%c0_21, %c0_22], %65 {strides = array<i32>} : memref<128x128xf32, #tpu.memory_space<vmem>>, vector<64x128xf32>,
    %c64_23 = arith.constant 64 : index
    %c0_24 = arith.constant 0 : index
    %84 = vector.load %arg6[%c64_23, %c0_24] : memref<128x128xf32, #tpu.memory_space<vmem>>, vector<64x128xf32>
    tpu.vector_store %arg6[%c64_23, %c0_24], %76 {strides = array<i32>} : memref<128x128xf32, #tpu.memory_space<vmem>>, vector<64x128xf32>,
    %c0_25 = arith.constant 0 : index
    %c0_26 = arith.constant 0 : index
    %c0_27 = arith.constant 0 : index
    %c0_28 = arith.constant 0 : index
    %85 = vector.load %arg4[%c0_25, %c0_26, %c0_27, %c0_28] : memref<1x1x128x128xf32, #tpu.memory_space<vmem>>, vector<1x1x128x128xf32>
    %86 = vector.shape_cast %85 : vector<1x1x128x128xf32> to vector<128x128xf32>
    %c0_29 = arith.constant 0 : index
    %c0_30 = arith.constant 0 : index
    %87 = vector.load %arg5[%c0_29, %c0_30] : memref<128x128xf32, #tpu.memory_space<vmem>>, vector<128x128xf32>
    %c0_31 = arith.constant 0 : index
    %c0_32 = arith.constant 0 : index
    %88 = vector.load %arg6[%c0_31, %c0_32] : memref<128x128xf32, #tpu.memory_space<vmem>>, vector<128x128xf32>
    %cst_33 = arith.constant dense<0.000000e+00> : vector<128x128xf32>
    %89 = tpu.matmul %87, %88, %cst_33 {dimension_numbers = #tpu.dot_dimension_numbers<[1], [1], [0], [0], [0, 0, 1, 0], [], []>} : vector<128x128xf32>, vector<128x128xf32>, vector<128x128xf32> -> vector<128x128xf32>
    %90 = arith.addf %86, %89 : vector<128x128xf32>
    %c0_34 = arith.constant 0 : index
    %c0_35 = arith.constant 0 : index
    %c0_36 = arith.constant 0 : index
    %c0_37 = arith.constant 0 : index
    %91 = vector.load %arg4[%c0_34, %c0_35, %c0_36, %c0_37] : memref<1x1x128x128xf32, #tpu.memory_space<vmem>>, vector<1x1x128x128xf32>
    %92 = vector.shape_cast %91 : vector<1x1x128x128xf32> to vector<128x128xf32>
    %93 = vector.shape_cast %90 : vector<128x128xf32> to vector<1x1x128x128xf32>
    tpu.vector_store %arg4[%c0_34, %c0_35, %c0_36, %c0_37], %93 {strides = array<i32>} : memref<1x1x128x128xf32, #tpu.memory_space<vmem>>, vector<1x1x128x128xf32>,
    return
  }
  func.func @transform_0(%arg0: i32, %arg1: i32, %arg2: i32) -> (i32, i32, i32) {
    %c1_i32 = arith.constant 1 : i32
    %0 = arith.muli %arg0, %c1_i32 : i32
    %1 = arith.addi %0, %arg2 : i32
    %c0_i32 = arith.constant 0 : i32
    %c0_i32_0 = arith.constant 0 : i32
    return %arg1, %c0_i32, %1 : i32, i32, i32
  }
  func.func @transform_1(%arg0: i32, %arg1: i32, %arg2: i32) -> (i32, i32, i32, i32) {
    %c0_i32 = arith.constant 0 : i32
    %c0_i32_0 = arith.constant 0 : i32
    %c0_i32_1 = arith.constant 0 : i32
    return %arg0, %arg1, %c0_i32, %c0_i32_0 : i32, i32, i32, i32
  }
}

</mosaic_0001>

<bundles_post_ra>
// kernel: tpu_custom_call.1
= control target key start
LH: loop header
LB: loop body
LE: loop exit
PB: predicated region body
PF: predicated region fallthrough
CT: control target
= control target key end

     0   :  { %6 = vsyncpa [#allocation5], 0  ;;  %s1529_s0 = inlined_call_operand.vmem [shape: f32[2,3,256], index: 0, kind: input, shape index: {}]   ;;  %s1530_s1 = inlined_call_operand.hbm [shape: f32[2,2,128,128], index: 1, kind: output, shape index: {}]  }
   0x1   :  { %8 = vsyncpa [#allocation5 + $0x1], 0  ;;  %s1183_s6 = smov 0   ;;  %s1185_s7 = smov 0  }
   0x2   :  { %s1187_s8 = smov 0   ;;  %s1189_s9 = smov 0  }
   0x3   :  { %s1191_s10 = smov 0   ;;  %s1193_s11 = smov 0  }
   0x4   :  { %s1195_s12 = smov 0   ;;  %s1197_s13 = smov 0  }
   0x5 LB: > { %s807_s14 = sadd.s32 4294967295, %s1168_s13   ;;  %s808_s15 = sadd.s32 4294967294, %s1168_s13   ;;  %s1168_s13 = sphi %s1197_s13, %s14_s13   ;;  %s1164_s12 = sphi %s1195_s12, %s1539_s12   ;;  %s1160_s11 = sphi %s1193_s11, %s1538_s11   ;;  %s1156_s10 = sphi %s1191_s10, %s1537_s10   ;;  %s1152_s9 = sphi %s1189_s9, %s1536_s9   ;;  %s1148_s8 = sphi %s1187_s8, %s1535_s8   ;;  %s1144_s7 = sphi %s1185_s7, %s1534_s7   ;;  %s1140_s6 = sphi %s1183_s6, %s1533_s6  }
   0x6   : > { %s29_s16 = sadd.s32 1, %s1160_s11  ;;  %s33_s17 = sadd.s32 1, %s1164_s12 }
   0x7   : > { %p31_p0 = scmp.ge.s32.totalorder %s29_s16, 2  ;;  %p82_p1 = scmp.ne.s32.totalorder %s1148_s8, %s1144_s7 }
   0x8   : > { %p83_p2 = scmp.eq.s32.totalorder %s807_s14, 3  ;;  %p88_p5 = scmp.ne.s32.totalorder %s1144_s7, %s1140_s6 }
   0x9   : > { %s1541_s16 = smov (%p31_p0, %s29_s16), 0  ;;  %s1543_s17 = smov (!%p31_p0, %s33_s17), %s1164_s12 }
   0xa   : > { %s68_s18 = ssub.s32 %s1160_s11, %s1541_s16  ;;  %p1234_p3 = por %p83_p2, %p82_p1 }
   0xb   : > { %p35_p4 = scmp.ge.s32.totalorder %s1543_s17, 2  ;;  %p89_p6 = scmp.eq.s32.totalorder %s808_s15, 3 }
   0xc   : > { %p811_p7 = scmp.ge.s32.totalorder %s1168_s13, 1  ;;  %p120_p9 = scmp.lt.s32.totalorder %s1168_s13, 5 }
   0xd   : > { %s1545_s17 = smov (%p35_p4, %s1543_s17), 0  ;;  %p1243_p8 = por %p89_p6, %p88_p5 }
   0xe   : > { %s67_s21 = ssub.s32 %s1164_s12, %s1545_s17  ;;  %s72_s22 = sadd.s32 1, %s1148_s8 }
   0xf   : > { %s69_s23 = sor.u32 %s68_s18, %s67_s21  ;;  %p121_p10 = pnand %p811_p7, %p120_p9 }
  0x10   : > { %p70_p11 = scmp.eq.s32.totalorder %s69_s23, 0  ;;  %p145_p12 = scmp.lt.s32.totalorder (!%p121_p10), %s1152_s9, 1 }
  0x11   : > { %124 = sbr.rel (%p121_p10) target bundleno = 366 (0x16e), region = 24  ;;  %p147_p13 = scmp.lt.s32.totalorder (!%p121_p10), %s1156_s10, 1 }
  0x12   : > { %s1252_s24 = scalar_select %p70_p11, %s1148_s8, %s72_s22  }
  0x13   : > { %s815_s4 = sshll.u32 (!%p121_p10), %s1156_s10, 7  ;;  %s141_s5 = sand.u32 (!%p121_p10), 1, %s1144_s7  }
  0x14   : > { %s812_s14 = sshll.u32 (!%p121_p10), %s141_s5, 7  ;;  %s825_s18 = sshll.u32 (!%p121_p10), %s1152_s9, 4 }
  0x15   : > { %s1448_s15 = scalar_lea.vmem (!%p121_p10), [#allocation4], %s812_s14  ;;  %s826_s21 = sshll.u32 (!%p121_p10), %s1156_s10, 5 }
  0x16   : > { %s146_s25 = scalar_select %p145_p12, %s1152_s9, 1  ;;  %v175_v0 = vlaneseq  ;;  %vm183_vm0 = vcmask 1042432  }
  0x17   : > { %s148_s26 = scalar_select %p147_p13, %s1156_s10, 1 }
  0x18   : > { %s813_s27 = sshll.u32 %s146_s25, 1  ;;  %v1262_v3 = vshrl.u32 %v175_v0, 7  ;;  %s719_s22 = sadd.s32 %s826_s21, %s825_s18 }
  0x19   : > { %s150_s28 = sadd.s32 %s813_s27, %s148_s26  ;;  %s827_s9 = sshll.u32 %s719_s22, 7 }
  0x1a   : > { %s814_s29 = sshll.u32 %s150_s28, 2  ;;  %v218_v5 = vadd.s32 56, %v1262_v3  ;;  %v217_v7 = vadd.s32 48, %v1262_v3  ;;  %v216_v8 = vadd.s32 40, %v1262_v3  ;;  %v215_v9 = vadd.s32 32, %v1262_v3  ;;  %s722_s10 = sshll.u32 %s1448_s15, 4  ;;  %s1470_s10 = int_to_ptr.vmem [resolvable:$true] %s722_s10 }
  0x1b   : > { %s152_s3 = scalar_lea.vmem %s1529_s0, %s814_s29  ;;  %v214_v10 = vadd.s32 24, %v1262_v3  ;;  %v213_v13 = vadd.s32 16, %v1262_v3  ;;  %v212_v21 = vadd.s32 8, %v1262_v3  ;;  %v375_v38 = vsub.s32 1, %v1262_v3  ;;  %s1468_s26 = scalar_lea.hbm %s1530_s1, %s827_s9 }
  0x1c   : > { %v174_v1 = vld [vmem:[%s152_s3] sm:$0x7]  ;;  %v226_v12 = vcvt.s32.f32 %v218_v5  ;;  %v225_v14 = vcvt.s32.f32 %v217_v7  ;;  %v224_v15 = vcvt.s32.f32 %v216_v8  ;;  %v223_v16 = vcvt.s32.f32 %v215_v9  ;;  %s1478_s27 = scalar_lea.sflag [#allocation5], %s141_s5  ;;  %s1076_s28 = scalar_lea.vmem %s1470_s10, 2048 }
  0x1d   : > { %v200_v2 = vadd.f32 1e-06, %v174_v1  ;;  %v182_v4 = vmul.f32 %v174_v1, %v174_v1  ;;  %v222_v17 = vcvt.s32.f32 %v214_v10  ;;  %v221_v20 = vcvt.s32.f32 %v213_v13  ;;  %p1077_p0 = scmp.ne.s32.totalorder %s1470_s10, %s1076_s28  ;;  %s1170_s29 = smov [#allocation4]  }
  0x1e   : > { %v234_v19 = vmul.f32 0.0952381, %v226_v12  ;;  %v233_v22 = vmul.f32 0.0952381, %v225_v14  ;;  %v232_v23 = vmul.f32 0.0952381, %v224_v15  ;;  %v220_v31 = vcvt.s32.f32 %v212_v21 }
  0x1f   : > { %1024 = vlog2.f32 %v200_v2  ;;  %v184_v6 = vsel %vm183_vm0, %v182_v4, 0.0  ;;  %v231_v24 = vmul.f32 0.0952381, %v223_v16  ;;  %v230_v26 = vmul.f32 0.0952381, %v222_v17  ;;  %p1078_p1 = pnand %p1077_p0, %p1234_p3  ;;  %s1080_s30 = sshll.u32 %s1170_s29, 4  ;;  %s1081_s30 = int_to_ptr.vmem [resolvable:$false] %s1080_s30 }
  0x20   : > { %v185_v11 = vrot.slane %v184_v6, 4  ;;  %v823_v29 = vadd.f32 -3.0, %v234_v19  ;;  %v229_v30 = vmul.f32 0.0952381, %v221_v20  ;;  %v822_v33 = vadd.f32 -3.0, %v233_v22  ;;  %s1082_s2 = scalar_lea.vmem %s1081_s30, 4096  ;;  %p1083_p4 = scmp.lt.s32.totalorder %s1470_s10, %s1081_s30 }
  0x21   : > { %v821_v34 = vadd.f32 -3.0, %v232_v23  ;;  %v820_v35 = vadd.f32 -3.0, %v231_v24  ;;  %v819_v36 = vadd.f32 -3.0, %v230_v26  ;;  %v219_v39 = vcvt.s32.f32 %v1262_v3  ;;  %p1079_p2 = pneg %p1078_p1  ;;  %p1084_p5 = scmp.lt.s32.totalorder %s1082_s2, %s1076_s28 }
  0x22   : > { %v186_v18 = vadd.f32 %v185_v11, %v184_v6  ;;  %v1273_v41 = vmul.f32 50.0, %v823_v29  ;;  %v818_v42 = vadd.f32 -3.0, %v229_v30  ;;  %v228_v43 = vmul.f32 0.0952381, %v220_v31 }
  0x23   : > { %v1275_v45 = vmul.f32 50.0, %v822_v33  ;;  %v1277_v46 = vmul.f32 50.0, %v821_v34  ;;  %v1279_v47 = vmul.f32 50.0, %v820_v35  ;;  %v1281_v48 = vmul.f32 50.0, %v819_v36  ;;  %p1085_p6 = por %p1084_p5, %p1083_p4 }
  0x24   : > { %v187_v28 = vrot.slane %v186_v18, 2  ;;  %v1283_v52 = vmul.f32 50.0, %v818_v42  ;;  %v817_v53 = vadd.f32 -3.0, %v228_v43  ;;  %v227_v54 = vmul.f32 0.0952381, %v219_v39 }
  0x25   : > { %v255_v13 = vsub.s32 0, %v1262_v3  ;;  %p1086_p7 = pnand %p1085_p6, %p1079_p2 }
  0x26   : > { %v188_v40 = vadd.f32 %v187_v28, %v186_v18  ;;  %v1291_v5 = vmul.f32 50.0, %v817_v53  ;;  %v816_v6 = vadd.f32 -3.0, %v227_v54 }
  0x28   : > { %v189_v51 = vrot.slane %v188_v40, 1  ;;  %v243_v15 = vmul.f32 50.0, %v816_v6 }
  0x2a   : > { %v190_v2 = vadd.f32 %v189_v51, %v188_v40 }
  0x2c   : > { %v1025_v25 = vpop.eup %1024  ;;  %v1294_v14 = vadd.f32 1e-06, %v190_v2 }
  0x2d   : > { %v202_v27 = vmul.f32 0.6931472, %v1025_v25 }
  0x2e   : > { %vm194_vm1 = vcmp.eq.f32.partialorder %v1294_v14, inf  ;;  %vm196_vm2 = vcmp.eq.f32.partialorder %v1294_v14, 0.0 }
  0x2f   : > { %v204_v32 = vrot.slane %v202_v27, 1  ;;  %v207_v49 = vrot.slane %v202_v27, 2 }
  0x31   : > { %v206_v37 = vsub.f32 %v202_v27, %v204_v32  ;;  %v209_v60 = vsub.f32 %v202_v27, %v207_v49 }
  0x33   : > { %v251_v44 = vmul.f32 50.0, %v206_v37  ;;  %v252_v12 = vmul.f32 50.0, %v209_v60  ;;  %v179_v60 = vstv %s815_s4 }
  0x35   : > { %v376_v50 = vrot.slane %v251_v44, %v375_v38  ;;  %v1297_v19 = vrot.slane %v251_v44, %v255_v13  ;;  %v1299_v20 = vrot.slane %v252_v12, %v255_v13  ;;  %v197_v12 = vand.u32 2147483648, %v1294_v14 }
  0x37   : > { %v384_v55 = vsub.f32 %v1273_v41, %v376_v50  ;;  %v383_v56 = vsub.f32 %v1275_v45, %v376_v50  ;;  %v382_v57 = vsub.f32 %v1277_v46, %v376_v50  ;;  %v381_v58 = vsub.f32 %v1279_v47, %v376_v50 }
  0x38   : > { %v380_v59 = vsub.f32 %v1281_v48, %v376_v50  ;;  %v379_v4 = vsub.f32 %v1283_v52, %v376_v50  ;;  %v378_v18 = vsub.f32 %v1291_v5, %v376_v50  ;;  %v377_v21 = vsub.f32 %v243_v15, %v376_v50 }
  0x39   : > { %v392_v61 = vmul.f32 %v384_v55, %v384_v55  ;;  %v391_v62 = vmul.f32 %v383_v56, %v383_v56  ;;  %v390_v63 = vmul.f32 %v382_v57, %v382_v57  ;;  %v389_v1 = vmul.f32 %v381_v58, %v381_v58 }
  0x3a   : > { %v388_v10 = vmul.f32 %v380_v59, %v380_v59  ;;  %v387_v17 = vmul.f32 %v379_v4, %v379_v4  ;;  %v386_v3 = vmul.f32 %v378_v18, %v378_v18  ;;  %v317_v23 = vsub.f32 %v243_v15, %v1299_v20 }
  0x3b   : > { %v400_v7 = vadd.f32 1.0, %v392_v61  ;;  %v399_v8 = vadd.f32 1.0, %v391_v62  ;;  %v398_v9 = vadd.f32 1.0, %v390_v63  ;;  %v397_v11 = vadd.f32 1.0, %v389_v1 }
  0x3c   : > { %v396_v16 = vadd.f32 1.0, %v388_v10  ;;  %v1302_v22 = vadd.f32 1.0, %v387_v17  ;;  %v257_v24 = vsub.f32 %v243_v15, %v1297_v19  ;;  %v325_v25 = vmul.f32 %v317_v23, %v317_v23 }
  0x3d   : > { %1026 = vrcp.f32 %v400_v7  ;;  %v324_v26 = vsub.f32 %v1273_v41, %v1299_v20  ;;  %v1309_v28 = vadd.f32 1.0, %v386_v3  ;;  %v385_v29 = vmul.f32 %v377_v21, %v377_v21 }
  0x3e   : > { %1028 = vrcp.f32 %v399_v8  ;;  %v265_v27 = vmul.f32 %v257_v24, %v257_v24  ;;  %v1311_v30 = vadd.f32 1.0, %v325_v25  ;;  %v323_v34 = vsub.f32 %v1275_v45, %v1299_v20 }
  0x3f   : > { %1030 = vrcp.f32 %v398_v9  ;;  %v332_v33 = vmul.f32 %v324_v26, %v324_v26  ;;  %v1318_v37 = vadd.f32 1.0, %v385_v29  ;;  %v322_v51 = vsub.f32 %v1277_v46, %v1299_v20 }
  0x40   : > { %1032 = vrcp.f32 %v397_v11  ;;  %v1313_v31 = vadd.f32 1.0, %v265_v27  ;;  %v331_v50 = vmul.f32 %v323_v34, %v323_v34  ;;  %v176_v59 = vand.u32 127, %v175_v0 }
  0x41   : > { %1034 = vrsqrt.f32 %v1294_v14  ;;  %v1322_v49 = vadd.f32 1.0, %v332_v33  ;;  %v330_v62 = vmul.f32 %v322_v51, %v322_v51  ;;  %v321_v63 = vsub.f32 %v1279_v47, %v1299_v20 }
  0x42   : > { %1036 = vrcp.f32 %v396_v16  ;;  %v1330_v61 = vadd.f32 1.0, %v331_v50  ;;  %v319_v3 = vsub.f32 %v1283_v52, %v1299_v20 }
  0x43   : > { %1038 = vrcp.f32 %v1302_v22  ;;  %v329_v10 = vmul.f32 %v321_v63, %v321_v63 }
  0x44   : > { %1040 = vrcp.f32 %v1309_v28 }
  0x45   : > { %1042 = vrcp.f32 %v1311_v30  ;;  %v1350_v24 = vadd.f32 1.0, %v329_v10 }
  0x46   : > { %1044 = vrcp.f32 %v1313_v31 }
  0x47   : > { %1046 = vrcp.f32 %v1318_v37 }
  0x48   : > { %1048 = vrcp.f32 %v1322_v49 }
  0x49   : > { %1050 = vrcp.f32 %v1330_v61 }
  0x4a   : > { %v1027_v32 = vpop.eup %1026 }
  0x4b   : > { %v1029_v35 = vpop.eup %1028  ;;  %v416_v36 = vmul.f32 %v1027_v32, %v400_v7  ;;  %v320_v7 = vsub.f32 %v1281_v48, %v1299_v20 }
  0x4c   : > { %v1031_v38 = vpop.eup %1030  ;;  %v415_v39 = vmul.f32 %v1029_v35, %v399_v8  ;;  %v180_v8 = vadd.s32 %v179_v60, %v176_v59 }
  0x4d   : > { %v1033_v40 = vpop.eup %1032  ;;  %v424_v42 = vsub.f32 2.0, %v416_v36  ;;  %v414_v43 = vmul.f32 %v1031_v38, %v398_v9  ;;  %v1339_v9 = vadd.f32 1.0, %v330_v62  ;;  %v328_v21 = vmul.f32 %v320_v7, %v320_v7 }
  0x4e   : > { %v423_v44 = vsub.f32 2.0, %v415_v39  ;;  %v1035_v53 = vpop.eup %1034  ;;  %v413_v56 = vmul.f32 %v1033_v40, %v397_v11  ;;  %vm181_vm3 = vcmp.lt.s32.totalorder %v180_v8, 256 }
  0x4f   : > { %v432_v54 = vmul.f32 %v1027_v32, %v424_v42  ;;  %v422_v55 = vsub.f32 2.0, %v414_v43  ;;  %v1037_v57 = vpop.eup %1036  ;;  %v193_v1 = vmul.f32 %v1035_v53, %v1294_v14  ;;  %1052 = vrcp.f32 %v1339_v9 }
  0x50   : > { %v431_v58 = vmul.f32 %v1029_v35, %v423_v44  ;;  %v421_v4 = vsub.f32 2.0, %v413_v56  ;;  %v412_v6 = vmul.f32 %v1037_v57, %v396_v16  ;;  %v1039_v0 = vpop.eup %1038  ;;  %v327_v35 = vmul.f32 %v319_v3, %v319_v3 }
  0x51   : > { %862 = vmatprep.subr.mxu0 %v432_v54  ;;  %918 = vmatprep.subr.mxu1 %v432_v54  ;;  %v430_v2 = vmul.f32 %v1031_v38, %v422_v55  ;;  %v195_v11 = vsel %vm194_vm1, %v1294_v14, %v193_v1  ;;  %v411_v16 = vmul.f32 %v1039_v0, %v1302_v22  ;;  %v1041_v17 = vpop.eup %1040  ;;  %1054 = vrcp.f32 %v1350_v24 }
  0x52   : > { %863 = vmatpush3.xpose.msra.mxu0 %v432_v54  ;;  %934 = vmatpush3.xpose.msra.mxu1 %v432_v54  ;;  %v429_v13 = vmul.f32 %v1033_v40, %v421_v4  ;;  %v420_v15 = vsub.f32 2.0, %v412_v6  ;;  %v1043_v18 = vpop.eup %1042  ;;  %v198_v22 = vsel %vm196_vm2, %v197_v12, %v195_v11  ;;  %v410_v29 = vmul.f32 %v1041_v17, %v1309_v28 }
  0x53   : > { %864 = vmatprep.subr.mxu0 %v431_v58  ;;  %919 = vmatprep.subr.mxu1 %v431_v58  ;;  %v1045_v23 = vpop.eup %1044  ;;  %v349_v25 = vmul.f32 %v1043_v18, %v1311_v30  ;;  %v419_v27 = vsub.f32 2.0, %v411_v16  ;;  %v1358_v36 = vsel %vm181_vm3, %v198_v22, 0.0  ;;  %v1361_v14 = vadd.f32 1.0, %v328_v21 }
  0x54   : > { %v428_v26 = vmul.f32 %v1037_v57, %v420_v15  ;;  %v289_v32 = vmul.f32 %v1045_v23, %v1313_v31  ;;  %v1047_v33 = vpop.eup %1046  ;;  %v318_v30 = vsub.f32 %v1291_v5, %v1299_v20  ;;  %v418_v31 = vsub.f32 2.0, %v410_v29 }
  0x55   : > { %v357_v34 = vsub.f32 2.0, %v349_v25  ;;  %v427_v28 = vmul.f32 %v1039_v0, %v419_v27  ;;  %v409_v40 = vmul.f32 %v1047_v33, %v1318_v37  ;;  %v1049_v43 = vpop.eup %1048  ;;  %v1371_v51 = vadd.f32 1.0, %v327_v35 }
  0x56   : > { %865 = vmatpush3.xpose.msra.mxu0 %v431_v58  ;;  %935 = vmatpush3.xpose.msra.mxu1 %v431_v58  ;;  %v297_v38 = vsub.f32 2.0, %v289_v32  ;;  %v326_v20 = vmul.f32 %v318_v30, %v318_v30  ;;  %v426_v53 = vmul.f32 %v1041_v17, %v418_v31  ;;  %v356_v55 = vmul.f32 %v1049_v43, %v1322_v49  ;;  %v1051_v37 = vpop.eup %1050 }
  0x57   : > { %866 = vmatprep.subr.mxu0 %v430_v2  ;;  %920 = vmatprep.subr.mxu1 %v430_v2  ;;  %v1365_v39 = vmul.f32 %v1043_v18, %v357_v34  ;;  %v417_v54 = vsub.f32 2.0, %v409_v40  ;;  %1056 = vrcp.f32 %v1361_v14  ;;  %v258_v56 = vsub.f32 %v1291_v5, %v1297_v19 }
  0x58   : > { %v305_v42 = vmul.f32 %v1045_v23, %v297_v38  ;;  %v1377_v57 = vadd.f32 1.0, %v326_v20  ;;  %v259_v58 = vsub.f32 %v1283_v52, %v1297_v19  ;;  %v364_v49 = vsub.f32 2.0, %v356_v55 }
  0x59   : > { %v449_v44 = vmul.f32 %v1365_v39, %v1358_v36  ;;  %v425_v60 = vmul.f32 %v1047_v33, %v417_v54  ;;  %v355_v62 = vmul.f32 %v1051_v37, %v1330_v61  ;;  %1058 = vrcp.f32 %v1371_v51 }
  0x5a   : > { %867 = vmatpush3.xpose.msra.mxu0 %v430_v2  ;;  %936 = vmatpush3.xpose.msra.mxu1 %v430_v2  ;;  %v433_v50 = vmul.f32 %v305_v42, %v1358_v36  ;;  %v266_v63 = vmul.f32 %v258_v56, %v258_v56  ;;  %v260_v5 = vsub.f32 %v1281_v48, %v1297_v19  ;;  %1060 = vrcp.f32 %v1377_v57 }
  0x5b   : > { %868 = vmatprep.subr.mxu0 %v429_v13  ;;  %921 = vmatprep.subr.mxu1 %v429_v13  ;;  %v267_v1 = vmul.f32 %v259_v58, %v259_v58  ;;  %v261_v2 = vsub.f32 %v1279_v47, %v1297_v19  ;;  %v1387_v4 = vmul.f32 %v1049_v43, %v364_v49  ;;  %v363_v6 = vsub.f32 2.0, %v355_v62 }
  0x5c   : > { %894 = vmatprep.mubr.f32.mxu0 %v433_v50  ;;  %906 = vmatprep.mubr.f32.mxu1 %v449_v44  ;;  %v1053_v59 = vpop.eup %1052  ;;  %v274_v0 = vadd.f32 1.0, %v266_v63  ;;  %v268_v7 = vmul.f32 %v260_v5, %v260_v5  ;;  %v262_v48 = vsub.f32 %v1277_v46, %v1297_v19  ;;  %v263_v47 = vsub.f32 %v1275_v45, %v1297_v19 }
  0x5d   : > { %v354_v61 = vmul.f32 %v1053_v59, %v1339_v9  ;;  %v275_v8 = vadd.f32 1.0, %v267_v1  ;;  %v269_v10 = vmul.f32 %v261_v2, %v261_v2  ;;  %v1397_v11 = vmul.f32 %v1051_v37, %v363_v6 }
  0x5e   : > { %869 = vmatpush3.xpose.msra.mxu0 %v429_v13  ;;  %937 = vmatpush3.xpose.msra.mxu1 %v429_v13  ;;  %v1055_v52 = vpop.eup %1054  ;;  %1062 = vrcp.f32 %v274_v0  ;;  %v276_v15 = vadd.f32 1.0, %v268_v7  ;;  %v270_v46 = vmul.f32 %v262_v48, %v262_v48  ;;  %v264_v16 = vsub.f32 %v1273_v41, %v1297_v19 }
  0x5f   : > { %870 = vmatprep.subr.mxu0 %v428_v26  ;;  %922 = vmatprep.subr.mxu1 %v428_v26  ;;  %v362_v9 = vsub.f32 2.0, %v354_v61  ;;  %v353_v12 = vmul.f32 %v1055_v52, %v1350_v24  ;;  %1064 = vrcp.f32 %v275_v8  ;;  %v277_v45 = vadd.f32 1.0, %v269_v10 }
  0x60   : > { %v271_v17 = vmul.f32 %v263_v47, %v263_v47  ;;  %1066 = vrcp.f32 %v276_v15  ;;  %v278_v24 = vadd.f32 1.0, %v270_v46  ;;  %v272_v41 = vmul.f32 %v264_v16, %v264_v16 }
  0x61   : > { %v1406_v18 = vmul.f32 %v1053_v59, %v362_v9  ;;  %v361_v21 = vsub.f32 2.0, %v353_v12  ;;  %1068 = vrcp.f32 %v277_v45  ;;  %v455_v46 = vmul.f32 %v1397_v11, %v1358_v36 }
  0x62   : > { %871 = vmatpush3.xpose.msra.mxu0 %v428_v26  ;;  %938 = vmatpush3.xpose.msra.mxu1 %v428_v26  ;;  %v279_v19 = vadd.f32 1.0, %v271_v17  ;;  %1070 = vrcp.f32 %v278_v24  ;;  %v280_v29 = vadd.f32 1.0, %v272_v41 }
  0x63   : > { %872 = vmatprep.subr.mxu0 %v427_v28  ;;  %923 = vmatprep.subr.mxu1 %v427_v28  ;;  %v1413_v25 = vmul.f32 %v1055_v52, %v361_v21  ;;  %v454_v12 = vmul.f32 %v1406_v18, %v1358_v36 }
  0x64   : > { %v1057_v13 = vpop.eup %1056  ;;  %1072 = vrcp.f32 %v279_v19 }
  0x65   : > { %v352_v3 = vmul.f32 %v1057_v13, %v1361_v14  ;;  %1074 = vrcp.f32 %v280_v29 }
  0x66   : > { %873 = vmatpush3.xpose.msra.mxu0 %v427_v28  ;;  %939 = vmatpush3.xpose.msra.mxu1 %v427_v28  ;;  %v1059_v23 = vpop.eup %1058 }
  0x67   : > { %874 = vmatprep.subr.mxu0 %v426_v53  ;;  %924 = vmatprep.subr.mxu1 %v426_v53  ;;  %v360_v22 = vsub.f32 2.0, %v352_v3  ;;  %v351_v26 = vmul.f32 %v1059_v23, %v1371_v51  ;;  %v1061_v27 = vpop.eup %1060 }
  0x68   : > { %v350_v34 = vmul.f32 %v1061_v27, %v1377_v57 }
  0x69   : > { %v368_v32 = vmul.f32 %v1057_v13, %v360_v22  ;;  %v359_v33 = vsub.f32 2.0, %v351_v26 }
  0x6a   : > { %875 = vmatpush3.xpose.msra.mxu0 %v426_v53  ;;  %940 = vmatpush3.xpose.msra.mxu1 %v426_v53  ;;  %v358_v30 = vsub.f32 2.0, %v350_v34 }
  0x6b   : > { %876 = vmatprep.subr.mxu0 %v425_v60  ;;  %925 = vmatprep.subr.mxu1 %v425_v60  ;;  %v1063_v35 = vpop.eup %1062  ;;  %v367_v14 = vmul.f32 %v1059_v23, %v359_v33  ;;  %v452_v7 = vmul.f32 %v368_v32, %v1358_v36 }
  0x6c   : > { %v1065_v38 = vpop.eup %1064  ;;  %v290_v28 = vmul.f32 %v1063_v35, %v274_v0  ;;  %v366_v43 = vmul.f32 %v1061_v27, %v358_v30 }
  0x6d   : > { %v1067_v31 = vpop.eup %1066  ;;  %v291_v40 = vmul.f32 %v1065_v38, %v275_v8  ;;  %v451_v52 = vmul.f32 %v367_v14, %v1358_v36 }
  0x6e   : > { %877 = vmatpush3.xpose.msra.mxu0 %v425_v60  ;;  %941 = vmatpush3.xpose.msra.mxu1 %v425_v60  ;;  %v1069_v42 = vpop.eup %1068  ;;  %v298_v44 = vsub.f32 2.0, %v290_v28  ;;  %v292_v50 = vmul.f32 %v1067_v31, %v276_v15  ;;  %v450_v49 = vmul.f32 %v366_v43, %v1358_v36 }
  0x6f   : > { %878 = vmatprep.subr.mxu0 %v1387_v4  ;;  %926 = vmatprep.subr.mxu1 %v1387_v4  ;;  %v1071_v51 = vpop.eup %1070  ;;  %v299_v20 = vsub.f32 2.0, %v291_v40  ;;  %v293_v53 = vmul.f32 %v1069_v42, %v277_v45  ;;  %v456_v45 = vmul.f32 %v1387_v4, %v1358_v36 }
  0x70   : > { %v306_v55 = vmul.f32 %v1063_v35, %v298_v44  ;;  %v300_v37 = vsub.f32 2.0, %v292_v50  ;;  %v294_v56 = vmul.f32 %v1071_v51, %v278_v24 }
  0x71   : > { %v1073_v54 = vpop.eup %1072  ;;  %v307_v58 = vmul.f32 %v1065_v38, %v299_v20  ;;  %v301_v59 = vsub.f32 2.0, %v293_v53 }
  0x72   : > { %879 = vmatpush3.xpose.msra.mxu0 %v1387_v4  ;;  %942 = vmatpush3.xpose.msra.mxu1 %v1387_v4  ;;  %v1075_v57 = vpop.eup %1074  ;;  %v295_v60 = vmul.f32 %v1073_v54, %v279_v19  ;;  %v434_v62 = vmul.f32 %v306_v55, %v1358_v36  ;;  %v308_v63 = vmul.f32 %v1067_v31, %v300_v37  ;;  %v302_v5 = vsub.f32 2.0, %v294_v56 }
  0x73   : > { %880 = vmatprep.subr.mxu0 %v1397_v11  ;;  %927 = vmatprep.subr.mxu1 %v1397_v11  ;;  %v296_v1 = vmul.f32 %v1075_v57, %v280_v29  ;;  %v435_v2 = vmul.f32 %v307_v58, %v1358_v36  ;;  %v309_v6 = vmul.f32 %v1069_v42, %v301_v59 }
  0x74   : > { %v303_v61 = vsub.f32 2.0, %v295_v60  ;;  %v436_v0 = vmul.f32 %v308_v63, %v1358_v36  ;;  %v310_v48 = vmul.f32 %v1071_v51, %v302_v5 }
  0x75   : > { %v304_v8 = vsub.f32 2.0, %v296_v1  ;;  %v437_v10 = vmul.f32 %v309_v6, %v1358_v36 }
  0x76   : > { %881 = vmatpush3.xpose.msra.mxu0 %v1397_v11  ;;  %943 = vmatpush3.xpose.msra.mxu1 %v1397_v11  ;;  %v311_v47 = vmul.f32 %v1073_v54, %v303_v61  ;;  %v438_v9 = vmul.f32 %v310_v48, %v1358_v36 }
  0x77   : > { %882 = vmatprep.subr.mxu0 %v1406_v18  ;;  %928 = vmatprep.subr.mxu1 %v1406_v18  ;;  %v312_v13 = vmul.f32 %v1075_v57, %v304_v8 }
  0x78   : > { %v439_v15 = vmul.f32 %v311_v47, %v1358_v36 }
  0x79   : > { %v440_v16 = vmul.f32 %v312_v13, %v1358_v36 }
  0x7a   : > { %883 = vmatpush3.xpose.msra.mxu0 %v1406_v18  ;;  %944 = vmatpush3.xpose.msra.mxu1 %v1406_v18 }
  0x7b   : > { %884 = vmatprep.subr.mxu0 %v1413_v25  ;;  %929 = vmatprep.subr.mxu1 %v1413_v25 }
  0x7e   : > { %885 = vmatpush3.xpose.msra.mxu0 %v1413_v25  ;;  %945 = vmatpush3.xpose.msra.mxu1 %v1413_v25 }
  0x7f   : > { %886 = vmatprep.subr.mxu0 %v368_v32  ;;  %930 = vmatprep.subr.mxu1 %v368_v32 }
  0x82   : > { %887 = vmatpush3.xpose.msra.mxu0 %v368_v32  ;;  %946 = vmatpush3.xpose.msra.mxu1 %v368_v32 }
  0x83   : > { %888 = vmatprep.subr.mxu0 %v367_v14  ;;  %931 = vmatprep.subr.mxu1 %v367_v14 }
  0x86   : > { %889 = vmatpush3.xpose.msra.mxu0 %v367_v14  ;;  %947 = vmatpush3.xpose.msra.mxu1 %v367_v14 }
  0x87   : > { %890 = vmatprep.subr.mxu0 %v366_v43  ;;  %932 = vmatprep.subr.mxu1 %v366_v43 }
  0x8a   : > { %891 = vmatpush3.xpose.msra.mxu0 %v366_v43  ;;  %948 = vmatpush3.xpose.msra.mxu1 %v366_v43 }
  0x8b   : > { %892 = vmatprep.subr.mxu0 %v1365_v39  ;;  %933 = vmatprep.subr.mxu1 %v1365_v39 }
  0x8e   : > { %893 = vmatpush3.xpose.msra.mxu0 %v1365_v39  ;;  %949 = vmatpush3.xpose.msra.mxu1 %v1365_v39  ;;  %v453_v39 = vmul.f32 %v1413_v25, %v1358_v36 }
  0x91   : > { %895 = vmatmul.mubr.f32.vlgmr.msra.gmra.mxu0 %v434_v62  ;;  %907 = vmatmul.mubr.f32.vlgmr.msra.gmra.mxu1 %v450_v49 }
  0x92   : > { %897 = vmatprep.mubr.f32.mxu0 %v435_v2  ;;  %909 = vmatprep.mubr.f32.mxu1 %v451_v52 }
  0x95   : > { %898 = vmatmul.mubr.f32.gmra.mxu0 %v436_v0  ;;  %910 = vmatmul.mubr.f32.gmra.mxu1 %v452_v7 }
  0x96   : > { %900 = vmatprep.mubr.f32.mxu0 %v437_v10  ;;  %912 = vmatprep.mubr.f32.mxu1 %v453_v39 }
  0x99   : > { %901 = vmatmul.mubr.f32.gmra.mxu0 %v438_v9  ;;  %913 = vmatmul.mubr.f32.gmra.mxu1 %v454_v12 }
  0x9a   : > { %903 = vmatprep.mubr.f32.mxu0 %v439_v15  ;;  %915 = vmatprep.mubr.f32.mxu1 %v455_v46 }
  0x9d   : > { %904 = vmatmul.mubr.f32.gmra.mxu0 %v440_v16  ;;  %916 = vmatmul.mubr.f32.gmra.mxu1 %v456_v45 }
 0x151   : > { %v896_v17 = vpop.f32.mrf.mxu0  ;;  %v908_v18 = vpop.f32.mrf.mxu1 }
 0x152   : > { %691 = vst [vmem:[%s1448_s15 + $0x8] sm:$0xff] %v896_v17  ;;  %699 = vst [vmem:[%s1448_s15 + $0x48] sm:$0xff] %v908_v18 }
 0x153   : > { %v595_v21 = vpop.f32.mrf.mxu0  ;;  %v635_v11 = vpop.f32.mrf.mxu1 }
 0x154   : > { %690 = vst [vmem:[%s1448_s15] sm:$0xff] %v595_v21  ;;  %698 = vst [vmem:[%s1448_s15 + $0x40] sm:$0xff] %v635_v11 }
 0x155   : > { %v899_v36 = vpop.f32.mrf.mxu0  ;;  %v911_v4 = vpop.f32.mrf.mxu1 }
 0x156   : > { %693 = vst [vmem:[%s1448_s15 + $0x18] sm:$0xff] %v899_v36  ;;  %701 = vst [vmem:[%s1448_s15 + $0x58] sm:$0xff] %v911_v4 }
 0x157   : > { %v605_v3 = vpop.f32.mrf.mxu0  ;;  %v645_v23 = vpop.f32.mrf.mxu1 }
 0x158   : > { %692 = vst [vmem:[%s1448_s15 + $0x10] sm:$0xff] %v605_v3  ;;  %700 = vst [vmem:[%s1448_s15 + $0x50] sm:$0xff] %v645_v23 }
 0x159   : > { %v902_v24 = vpop.f32.mrf.mxu0  ;;  %v914_v41 = vpop.f32.mrf.mxu1 }
 0x15a   : > { %695 = vst [vmem:[%s1448_s15 + $0x28] sm:$0xff] %v902_v24  ;;  %703 = vst [vmem:[%s1448_s15 + $0x68] sm:$0xff] %v914_v41 }
 0x15b   : > { %v615_v19 = vpop.f32.mrf.mxu0  ;;  %v655_v25 = vpop.f32.mrf.mxu1 }
 0x15c   : > { %694 = vst [vmem:[%s1448_s15 + $0x20] sm:$0xff] %v615_v19  ;;  %702 = vst [vmem:[%s1448_s15 + $0x60] sm:$0xff] %v655_v25 }
 0x15d   : > { %v905_v22 = vpop.f32.mrf.mxu0  ;;  %v917_v26 = vpop.f32.mrf.mxu1 }
 0x15e   : > { %697 = vst [vmem:[%s1448_s15 + $0x38] sm:$0xff] %v905_v22  ;;  %705 = vst [vmem:[%s1448_s15 + $0x78] sm:$0xff] %v917_v26 }
 0x15f   : > { %v625_v27 = vpop.f32.mrf.mxu0  ;;  %v665_v29 = vpop.f32.mrf.mxu1 }
 0x160   : > { %696 = vst [vmem:[%s1448_s15 + $0x30] sm:$0xff] %v625_v27  ;;  %704 = vst [vmem:[%s1448_s15 + $0x70] sm:$0xff] %v665_v29 }
 0x161   : > { %1089 = shalt.err (!%p1086_p7)
}
 0x162   : > { %s1090_s3 = scalar_lea.hbm %s1468_s26, 2048  ;;  %s1094_s14 = scalar_lea.hbm %s1530_s1, 8192 }
 0x163   : > { %p1091_p9 = scmp.ne.s32.totalorder %s1468_s26, %s1090_s3  ;;  %p1095_p12 = scmp.lt.s32.totalorder %s1468_s26, %s1530_s1 }
 0x164   : > { %p1096_p13 = scmp.lt.s32.totalorder %s1094_s14, %s1090_s3 }
 0x165   : > { %p1092_p10 = pnand %p1091_p9, %p1234_p3 }
 0x166   : > { %p1097_p0 = por %p1096_p13, %p1095_p12 }
 0x167   : > { %p1093_p11 = pneg %p1092_p10 }
 0x169   : > { %p1098_p1 = pnand %p1097_p0, %p1093_p11 }
 0x16b   : > { %1101 = shalt.err (!%p1098_p1)
}
 0x16c   : > { %s1171_s21 = smov 128   ;;  %s1172_s22 = smov 8  }
 0x16d   : > { %950 = dma.vmem_to_hbm [thread:$0]  (%p1234_p3), %s1470_s10, 2048, %s1468_s26, %s1478_s27, %s1171_s21, %s1171_s21, %s1172_s22  }
 0x16e PF: > { %p956_p2 = scmp.ge.s32.totalorder %s1168_s13, 2  ;;  %s737_s9 = sand.u32 1, %s1140_s6  }
 0x16f   : > { %s738_s23 = scalar_lea.sflag [#allocation5], %s737_s9 }
 0x170   : > { %p953_p4 = pnand %p956_p2, %p1243_p8 }
 0x172   : > { %p954_p5 = pneg %p953_p4 }
 0x174   : > { %1135 = dma.done.wait (%p954_p5), %s738_s23, 2048  }
 0x175   : > { %1137 = vsyncadd (%p954_p5), %s738_s23, 4294965248  ;;  %s14_s13 = sadd.s32 1, %s1168_s13   ;;  %s1533_s6 = smov %s1144_s7 }
 0x176   : > { %p11_p6 = scmp.ge.s32.totalorder %s14_s13, 6   ;;  %s1534_s7 = smov %s1148_s8 }
 0x177   : > { %s1535_s8 = smov %s1252_s24  ;;  %s1536_s9 = smov %s1160_s11 }
 0x178   : > { %s1537_s10 = smov %s1164_s12  ;;  %s1538_s11 = smov %s1541_s16 }
 0x179   : > { %s1539_s12 = smov %s1545_s17  ;;  %13 = sbr.rel (!%p11_p6) target bundleno = 5 (0x5), region = 63 }
 0x17e   :  { %743 = vsyncpa [#allocation5], 1 }
 0x17f   :  { %745 = vsyncpa [#allocation5 + $0x1], 1 }

</bundles_post_ra>
